<compile_context>
chip_gen: v7x
topology: tpu7x:2x2x1
jax: 0.10.0
libtpu: 0.0.40
codegen_flags: <defaults>
</compile_context>

<pallas_src>
import math
import functools

import jax
import jax.numpy as jnp
from jax.experimental import pallas as pl
from jax.experimental.pallas import tpu as pltpu


# ----------------------------------------------------------------------------
# Kernel
# ----------------------------------------------------------------------------
def _pos_enc_kernel(scale_ref, seed_ref, x_ref, pe_ref, o_ref, *, p, training):
    # scale_ref: SMEM (1,) f32    -- nn.Parameter(torch.ones(1))
    # seed_ref : SMEM (1,) i32    -- dropout seed (only used when training)
    # x_ref    : VMEM (ts, B, D)  -- input tile (lane dim = D)
    # pe_ref   : VMEM (ts, 1, D)  -- pe[:S] tile, broadcast over B in-kernel
    # o_ref    : VMEM (ts, B, D)
    scale = scale_ref[0]
    # (ts,B,D) + (ts,1,D): broadcast over the batch axis on the VPU; no extra
    # HBM traffic for pe beyond S*D total.
    y = x_ref[...] + scale * pe_ref[...]

    if training and p > 0.0:
        # Inverted dropout: keep with prob (1-p), scale kept values by 1/(1-p).
        # Seed strided by num_programs -> non-overlapping per-tile streams
        # across consecutive `seed` values.
        pltpu.prng_seed(seed_ref[0] * pl.num_programs(0) + pl.program_id(0))
        bits = pltpu.bitcast(pltpu.prng_random_bits(y.shape), jnp.uint32)
        # Integer threshold compare: P(bits >= thr) = 1 - p.
        thr = jnp.uint32(min(int(round(p * (1 << 32))), (1 << 32) - 1))
        keep = bits >= thr
        y = jnp.where(keep, y * jnp.float32(1.0 / (1.0 - p)), jnp.float32(0.0))
        # TODO(synk): PyTorch's dropout RNG stream cannot be reproduced
        # bit-exactly; only the distributional semantics match.

    o_ref[...] = y.astype(o_ref.dtype)


# ----------------------------------------------------------------------------
# Parameter / buffer construction (matches __init__)
# ----------------------------------------------------------------------------
def make_pe_buffer(max_len, d_model):
    """Reproduces the registered `pe` buffer: shape (max_len, 1, d_model)."""
    position = jnp.arange(max_len, dtype=jnp.float32)[:, None]              # (L,1)
    div_term = jnp.exp(
        jnp.arange(0, d_model, 2, dtype=jnp.float32) * (-math.log(10000.0) / d_model)
    )                                                                        # (D/2,)
    pe = jnp.zeros((max_len, d_model), jnp.float32)
    pe = pe.at[:, 0::2].set(jnp.sin(position * div_term))
    pe = pe.at[:, 1::2].set(jnp.cos(position * div_term))
    return pe[:, None, :]                                                    # (L,1,D)


# ----------------------------------------------------------------------------
# Wrapper
# ----------------------------------------------------------------------------
def _choose_seq_tile(S, row_bytes, target_bytes=4 * 1024 * 1024):
    """Rows per block: ~4 MiB of data, multiple of 8 rows, >=2 grid steps
    when S allows (so both v7x TensorCores get work)."""
    ts = (target_bytes // max(row_bytes, 1)) // 8 * 8
    ts = max(8, min(ts, S))
    if ts >= S and S >= 16:
        # Split into at least two blocks for megacore sharding.
        ts = min(S, ((pl.cdiv(S, 2) + 7) // 8) * 8)
    return ts


def positional_encoding(x, pe_buf, scale, *, p=0.1, training=False, seed=0):
    """x: (S, B, D) float32, pe_buf: (max_len, 1, D).  Returns (S, B, D)."""
    S, B, D = x.shape

    pe_s = pe_buf[:S]                                   # (S, 1, D) -- no B-tiling
    scale_arr = jnp.asarray(scale, jnp.float32).reshape((1,))
    seed_arr = jnp.asarray([seed], jnp.int32)

    itemsize = x.dtype.itemsize
    ts = _choose_seq_tile(S, B * D * itemsize)
    grid = (pl.cdiv(S, ts),)

    kernel = functools.partial(_pos_enc_kernel, p=float(p), training=bool(training))

    out = pl.pallas_call(
        kernel,
        out_shape=jax.ShapeDtypeStruct((S, B, D), x.dtype),
        grid=grid,
        in_specs=[
            pl.BlockSpec(memory_space=pltpu.MemorySpace.SMEM),       # scale
            pl.BlockSpec(memory_space=pltpu.MemorySpace.SMEM),       # seed
            pl.BlockSpec((ts, B, D), lambda i: (i, 0, 0)),           # x
            pl.BlockSpec((ts, 1, D), lambda i: (i, 0, 0)),           # pe[:S]
        ],
        out_specs=pl.BlockSpec((ts, B, D), lambda i: (i, 0, 0)),
        input_output_aliases={2: 0},        # out reuses x's buffer (needs donation)
        compiler_params=pltpu.CompilerParams(
            dimension_semantics=("parallel",),
            vmem_limit_bytes=32 * 1024 * 1024,
        ),
        cost_estimate=pl.CostEstimate(
            flops=2 * S * B * D,
            transcendentals=0,
            bytes_accessed=(2 * S * B * D + S * D) * itemsize + 8,
        ),
    )(scale_arr, seed_arr, x, pe_s)

    return out


# ----------------------------------------------------------------------------
# Main
# ----------------------------------------------------------------------------
if __name__ == "__main__":
    S, B, D = 16, 2, 128        # seq_len, batch, d_model (D multiple of 128 -> dense vst)
    MAX_LEN = 64

    key = jax.random.PRNGKey(0)
    x = jax.random.normal(key, (S, B, D), dtype=jnp.float32)

    # Deterministic parameter/buffer init (matches __init__):
    scale = jnp.ones((1,), jnp.float32)         # nn.Parameter(torch.ones(1))
    pe_buf = make_pe_buffer(MAX_LEN, D)         # registered buffer 'pe'

    # Pure-JAX reference (eval-mode forward: x + scale * pe[:S]) -- computed
    # BEFORE the kernel call because x is donated below.
    ref = x + scale[0] * pe_buf[:S]

    # Donate x so input_output_aliases={2: 0} actually avoids the extra copy.
    fwd = jax.jit(
        functools.partial(positional_encoding, p=0.1, training=False, seed=0),
        donate_argnums=(0,),
    )
    out = jax.block_until_ready(fwd(x, pe_buf, scale))

    assert out.shape == (S, B, D)
    assert jnp.allclose(out, ref, atol=1e-6, rtol=1e-6), "mismatch vs reference"

    print("KERNEL_OK")
</pallas_src>

<mosaic_0001>
module attributes {stable_mosaic.version = 11 : i64} {
  func.func @_pos_enc_kernel(%arg0: i32, %arg1: memref<1xf32, #tpu.memory_space<smem>>, %arg2: memref<1xi32, #tpu.memory_space<smem>>, %arg3: memref<8x2x128xf32, #tpu.memory_space<vmem>>, %arg4: memref<8x1x128xf32, #tpu.memory_space<vmem>>, %arg5: memref<8x2x128xf32, #tpu.memory_space<vmem>>) attributes {dimension_semantics = [#tpu.dimension_semantics<parallel>], iteration_bounds = array<i64: 2>, scalar_prefetch = 0 : i64, scratch_operands = 0 : i64, tpu.core_type = #tpu.core_type<tc>, window_params = [{transform_indices = @transform_0, window_bounds = array<i64: 1>}, {transform_indices = @transform_1, window_bounds = array<i64: 1>}, {transform_indices = @transform_2, window_bounds = array<i64: 8, 2, 128>}, {transform_indices = @transform_3, window_bounds = array<i64: 8, 1, 128>}, {transform_indices = @transform_4, window_bounds = array<i64: 8, 2, 128>}]} {
    %c0 = arith.constant 0 : index
    %0 = memref.load %arg1[%c0] : memref<1xf32, #tpu.memory_space<smem>>
    %c0_0 = arith.constant 0 : index
    %c0_1 = arith.constant 0 : index
    %c0_2 = arith.constant 0 : index
    %1 = vector.load %arg3[%c0_0, %c0_1, %c0_2] : memref<8x2x128xf32, #tpu.memory_space<vmem>>, vector<8x2x128xf32>
    %c0_3 = arith.constant 0 : index
    %c0_4 = arith.constant 0 : index
    %c0_5 = arith.constant 0 : index
    %2 = vector.load %arg4[%c0_3, %c0_4, %c0_5] : memref<8x1x128xf32, #tpu.memory_space<vmem>>, vector<8x1x128xf32>
    %3 = vector.broadcast %0 : f32 to vector<8x1x128xf32>
    %4 = arith.mulf %3, %2 : vector<8x1x128xf32>
    %5 = vector.broadcast %4 : vector<8x1x128xf32> to vector<8x2x128xf32>
    %6 = arith.addf %1, %5 : vector<8x2x128xf32>
    %c0_6 = arith.constant 0 : index
    %c0_7 = arith.constant 0 : index
    %c0_8 = arith.constant 0 : index
    %7 = vector.load %arg5[%c0_6, %c0_7, %c0_8] : memref<8x2x128xf32, #tpu.memory_space<vmem>>, vector<8x2x128xf32>
    tpu.vector_store %arg5[%c0_6, %c0_7, %c0_8], %6 {strides = array<i32>} : memref<8x2x128xf32, #tpu.memory_space<vmem>>, vector<8x2x128xf32>,
    return
  }
  func.func @transform_0(%arg0: i32) -> i32 {
    %c0_i32 = arith.constant 0 : i32
    %c0_i32_0 = arith.constant 0 : i32
    return %c0_i32 : i32
  }
  func.func @transform_1(%arg0: i32) -> i32 {
    %c0_i32 = arith.constant 0 : i32
    %c0_i32_0 = arith.constant 0 : i32
    return %c0_i32 : i32
  }
  func.func @transform_2(%arg0: i32) -> (i32, i32, i32) {
    %c0_i32 = arith.constant 0 : i32
    %c0_i32_0 = arith.constant 0 : i32
    %c0_i32_1 = arith.constant 0 : i32
    return %arg0, %c0_i32, %c0_i32_0 : i32, i32, i32
  }
  func.func @transform_3(%arg0: i32) -> (i32, i32, i32) {
    %c0_i32 = arith.constant 0 : i32
    %c0_i32_0 = arith.constant 0 : i32
    %c0_i32_1 = arith.constant 0 : i32
    return %arg0, %c0_i32, %c0_i32_0 : i32, i32, i32
  }
  func.func @transform_4(%arg0: i32) -> (i32, i32, i32) {
    %c0_i32 = arith.constant 0 : i32
    %c0_i32_0 = arith.constant 0 : i32
    %c0_i32_1 = arith.constant 0 : i32
    return %arg0, %c0_i32, %c0_i32_0 : i32, i32, i32
  }
}

</mosaic_0001>

<bundles_post_ra>
// kernel: positional_encoding.1
= control target key start
LH: loop header
LB: loop body
LE: loop exit
PB: predicated region body
PF: predicated region fallthrough
CT: control target
= control target key end

     0   :  { %s804_s0 = inlined_call_operand.<no memory space> [shape: f32[1], index: 0, kind: input, shape index: {}]   ;;  %s805_s1 = inlined_call_operand.<no memory space> [shape: s32[1], index: 1, kind: input, shape index: {}]   ;;  %s806_s2 = inlined_call_operand.hbm [shape: f32[16,2,128], index: 2, kind: input, shape index: {}, may-alias: {2,4}]   ;;  %s807_s3 = inlined_call_operand.vmem [shape: f32[16,1,128], index: 3, kind: input, shape index: {}]   ;;  %s808_s4 = inlined_call_operand.hbm [shape: f32[16,2,128], index: 4, kind: output, shape index: {}, may-alias: {2,4}]  }
   0x1   :  { %9 = sst [smem:[#allocation2]] %s804_s0 }
   0x2   :  { %11 = vsyncpa [#allocation5], 0 }
   0x3   :  { %13 = vsyncpa [#allocation5 + $0x1], 0 }
   0x4   :  { %14 = vsyncpa [#allocation6], 0 }
   0x5   :  { %16 = vsyncpa [#allocation6 + $0x1], 0  ;;  %s624_s17 = smov 0   ;;  %s626_s1 = smov 0  }
   0x6   :  { %s628_s18 = smov 0   ;;  %s630_s19 = smov 0  }
   0x7 LB: > { %s645_s0 = sadd.s32 4294967295, %s588_s19   ;;  %s425_s20 = sadd.s32 4294967294, %s588_s19   ;;  %s588_s19 = sphi %s630_s19, %s821_s19   ;;  %s584_s18 = sphi %s628_s18, %s820_s18   ;;  %s580_s1 = sphi %s626_s1, %s819_s1   ;;  %s576_s17 = sphi %s624_s17, %s818_s17  }
   0x8   : > { %s649_s21 = sadd.s32 1, %s588_s19   ;;  %s71_s22 = sadd.s32 1, %s584_s18 }
   0x9   : > { %s68_s23 = ssub.s32 %s588_s19, %s649_s21  ;;  %p78_p0 = scmp.ne.s32.totalorder %s584_s18, %s580_s1 }
   0xa   : > { %p69_p1 = scmp.eq.s32.totalorder %s68_s23, 0  ;;  %p79_p2 = scmp.eq.s32.totalorder %s588_s19, 0 }
   0xb   : > { %p84_p3 = scmp.ne.s32.totalorder %s580_s1, %s576_s17  ;;  %p85_p4 = scmp.eq.s32.totalorder %s645_s0, 0 }
   0xc   : > { %s661_s24 = scalar_select %p69_p1, %s584_s18, %s71_s22  }
   0xd   : > { %p663_p5 = por %p79_p2, %p78_p0  ;;  %p667_p6 = por %p85_p4, %p84_p3 }
   0xe   : > { %p134_p7 = scmp.eq.s32.totalorder %s645_s0, 1  ;;  %p140_p8 = scmp.eq.s32.totalorder %s425_s20, 1 }
   0xf   : > { %p454_p10 = scmp.lt.s32.totalorder %s588_s19, 2  ;;  %s166_s29 = sand.u32 1, %s584_s18  }
  0x10   : > { %p674_p11 = por %p134_p7, %p78_p0  ;;  %p678_p12 = por %p140_p8, %p84_p3 }
  0x11   : > { %s440_s30 = sshll.u32 %s588_s19, 8  ;;  %s428_s5 = sshll.u32 %s166_s29, 4 }
  0x12   : > { %s812_s27 = scalar_select %p674_p11, 1, 0 }
  0x13   : > { %s813_s28 = scalar_select %p678_p12, 1, 0 }
  0x14   : > { %s687_s8 = scalar_lea.hbm %s806_s2, %s440_s30  ;;  %s170_s9 = scalar_lea.vmem [#allocation4], %s428_s5 }
  0x15   : > { %s177_s10 = sshll.u32 %s170_s9, 4  ;;  %p691_p13 = pnand %p454_p10, %p663_p5  ;;  %s695_s10 = int_to_ptr.vmem [resolvable:$true] %s177_s10 }
  0x16   : > { %s697_s12 = scalar_lea.sflag [#allocation5], %s166_s29  ;;  %s492_s13 = scalar_lea.hbm %s687_s8, 256 }
  0x17   : > { %p493_p0 = scmp.ne.s32.totalorder %s687_s8, %s492_s13  ;;  %p494_p1 = pneg %p691_p13 }
  0x18   : > { %s497_s16 = scalar_lea.hbm %s806_s2, 512  ;;  %p498_p4 = scmp.lt.u32.totalorder %s687_s8, %s806_s2 }
  0x19   : > { %p495_p2 = pnand %p494_p1, %p493_p0  ;;  %p499_p5 = scmp.lt.u32.totalorder %s497_s16, %s492_s13 }
  0x1a   : > { %p501_p8 = scmp.lt.u32.totalorder %s492_s13, %s687_s8 }
  0x1b   : > { %p496_p3 = pneg %p495_p2  ;;  %p500_p7 = por %p499_p5, %p498_p4 }
  0x1d   : > { %p502_p10 = por %p501_p8, %p500_p7 }
  0x1f   : > { %p503_p9 = pnand %p502_p10, %p496_p3 }
  0x21   : > { %506 = shalt.err (!%p503_p9)
}
  0x22   : > { %s507_s23 = scalar_lea.vmem %s695_s10, 256  ;;  %s590_s25 = smov [#allocation4]  }
  0x23   : > { %p508_p0 = scmp.ne.s32.totalorder %s695_s10, %s507_s23  ;;  %s512_s29 = sshll.u32 %s590_s25, 4  ;;  %s513_s29 = int_to_ptr.vmem [resolvable:$false] %s512_s29 }
  0x24   : > { %s514_s30 = scalar_lea.vmem %s513_s29, 512  ;;  %p515_p11 = scmp.lt.s32.totalorder %s695_s10, %s513_s29 }
  0x25   : > { %p510_p2 = pnand %p508_p0, %p494_p1  ;;  %p516_p4 = scmp.lt.s32.totalorder %s514_s30, %s507_s23 }
  0x27   : > { %p511_p12 = pneg %p510_p2  ;;  %p517_p5 = por %p516_p4, %p515_p11 }
  0x29   : > { %p518_p7 = pnand %p517_p5, %p511_p12 }
  0x2b   : > { %521 = shalt.err (!%p518_p7)
}
  0x2c   : > { %s591_s5 = smov 32   ;;  %s592_s6 = smov 2  }
  0x2d   : > { %449 = dma.hbm_to_vmem [thread:$0]  (!%p691_p13), %s687_s8, 256, %s695_s10, %s697_s12, %s591_s5, %s591_s5, %s592_s6  }
  0x2e   : > { %p431_p9 = scmp.ge.s32.totalorder %s588_s19, 1  ;;  %p193_p1 = scmp.lt.s32.totalorder %s588_s19, 3 }
  0x30   : > { %p194_p3 = pnand %p431_p9, %p193_p1 }
  0x31   : > { %s728_s7 = sand.u32 (!%p194_p3), 1, %s580_s1  }
  0x32   : > { %197 = sbr.rel (%p194_p3) target bundleno = 90 (0x5a), region = 36  ;;  %s432_s9 = sshll.u32 (!%p194_p3), %s728_s7, 4 }
  0x33   : > { %s200_s13 = scalar_lea.sflag (!%p194_p3), [#allocation5], %s728_s7  ;;  %s734_s14 = scalar_lea.vmem (!%p194_p3), [#allocation4], %s432_s9 }
  0x39   : > { %567 = dma.done.wait (%p667_p6), %s200_s13, 256  }
  0x3a   : > { %569 = vsyncadd (%p667_p6), %s200_s13, 4294967040  ;;  %s434_s8 = sshll.u32 %s645_s0, 3  ;;  %v273_v0 = vlaneseq  ;;  %s239_s10 = sld [smem:[#allocation2]]  ;;  %v240_v8 = vld [vmem:[%s734_s14] sm:$0x3] }
  0x3b   : > { %p234_p11 = scmp.lt.s32.totalorder %s434_s8, 15  ;;  %v241_v9 = vld [vmem:[%s734_s14 + $0x2] sm:$0x3]  ;;  %v242_v14 = vld [vmem:[%s734_s14 + $0x4] sm:$0x3]  ;;  %s231_s26 = scalar_lea.vmem [#allocation7], %s432_s9 }
  0x3c   : > { %v274_v1 = vshrl.u32 %v273_v0, 7  ;;  %v243_v20 = vld [vmem:[%s734_s14 + $0x6] sm:$0x3]  ;;  %v244_v26 = vld [vmem:[%s734_s14 + $0x8] sm:$0x3]  ;;  %s343_s16 = sshll.u32 %s231_s26, 4  ;;  %s755_s16 = int_to_ptr.vmem [resolvable:$true] %s343_s16 }
  0x3d   : > { %s823_s8 = smov (!%p234_p11, %s434_s8), 15  ;;  %v245_v27 = vld [vmem:[%s734_s14 + $0xa] sm:$0x3]  ;;  %v246_v34 = vld [vmem:[%s734_s14 + $0xc] sm:$0x3]  ;;  %s441_s20 = sshll.u32 %s645_s0, 8 }
  0x3e   : > { %s236_s15 = scalar_lea.vmem %s807_s3, %s823_s8  ;;  %v275_v2 = vsub.s32 0, %v274_v1  ;;  %v247_v40 = vld [vmem:[%s734_s14 + $0xe] sm:$0x3]  ;;  %s760_s0 = scalar_lea.hbm %s808_s4, %s441_s20 }
  0x3f   : > { %v248_v3 = vld [vmem:[%s236_s15] sm:$0x1]  ;;  %v249_v6 = vld [vmem:[%s236_s15 + $0x1] sm:$0x1]  ;;  %v250_v7 = vld [vmem:[%s236_s15 + $0x2] sm:$0x1] }
  0x40   : > { %v256_v4 = vstv %s239_s10  ;;  %v251_v12 = vld [vmem:[%s236_s15 + $0x3] sm:$0x1]  ;;  %v252_v16 = vld [vmem:[%s236_s15 + $0x4] sm:$0x1]  ;;  %v253_v17 = vld [vmem:[%s236_s15 + $0x5] sm:$0x1] }
  0x41   : > { %v257_v5 = vmul.f32 %v256_v4, %v248_v3  ;;  %v258_v10 = vmul.f32 %v256_v4, %v249_v6  ;;  %v259_v11 = vmul.f32 %v256_v4, %v250_v7  ;;  %v260_v15 = vmul.f32 %v256_v4, %v251_v12  ;;  %v254_v23 = vld [vmem:[%s236_s15 + $0x6] sm:$0x1]  ;;  %v255_v29 = vld [vmem:[%s236_s15 + $0x7] sm:$0x1]  ;;  %s330_s25 = scalar_lea.sflag [#allocation6], %s728_s7  ;;  %s522_s29 = scalar_lea.vmem %s755_s16, 256 }
  0x42   : > { %v261_v21 = vmul.f32 %v256_v4, %v252_v16  ;;  %v262_v22 = vmul.f32 %v256_v4, %v253_v17  ;;  %v263_v28 = vmul.f32 %v256_v4, %v254_v23  ;;  %v264_v37 = vmul.f32 %v256_v4, %v255_v29  ;;  %p523_p6 = scmp.ne.s32.totalorder %s755_s16, %s522_s29  ;;  %p815_p12 = scmp.ne.s32.totalorder %s812_s27, 0 }
  0x43   : > { %v276_v13 = vrot.slane %v257_v5, %v275_v2  ;;  %v280_v18 = vrot.slane %v258_v10, %v275_v2  ;;  %v284_v19 = vrot.slane %v259_v11, %v275_v2  ;;  %v288_v25 = vrot.slane %v260_v15, %v275_v2  ;;  %s593_s30 = smov [#allocation7]  }
  0x44   : > { %v292_v32 = vrot.slane %v261_v21, %v275_v2  ;;  %v296_v33 = vrot.slane %v262_v22, %v275_v2  ;;  %v300_v36 = vrot.slane %v263_v28, %v275_v2  ;;  %v304_v42 = vrot.slane %v264_v37, %v275_v2  ;;  %p524_p13 = pnand %p523_p6, %p815_p12  ;;  %s526_s5 = sshll.u32 %s593_s30, 4  ;;  %s527_s5 = int_to_ptr.vmem [resolvable:$false] %s526_s5 }
  0x45   : > { %v313_v24 = vadd.f32 %v276_v13, %v240_v8  ;;  %v314_v30 = vadd.f32 %v280_v18, %v241_v9  ;;  %v315_v31 = vadd.f32 %v284_v19, %v242_v14  ;;  %v316_v35 = vadd.f32 %v288_v25, %v243_v20  ;;  %s528_s6 = scalar_lea.vmem %s527_s5, 512  ;;  %p529_p10 = scmp.lt.s32.totalorder %s755_s16, %s527_s5 }
  0x46   : > { %v317_v38 = vadd.f32 %v292_v32, %v244_v26  ;;  %v318_v39 = vadd.f32 %v296_v33, %v245_v27  ;;  %v319_v41 = vadd.f32 %v300_v36, %v246_v34  ;;  %v320_v43 = vadd.f32 %v304_v42, %v247_v40  ;;  %p525_p8 = pneg %p524_p13  ;;  %p530_p0 = scmp.lt.s32.totalorder %s528_s6, %s522_s29 }
  0x47   : > { %321 = vst [vmem:[%s231_s26] sm:$0x3] %v313_v24  ;;  %322 = vst [vmem:[%s231_s26 + $0x2] sm:$0x3] %v314_v30 }
  0x48   : > { %323 = vst [vmem:[%s231_s26 + $0x4] sm:$0x3] %v315_v31  ;;  %324 = vst [vmem:[%s231_s26 + $0x6] sm:$0x3] %v316_v35  ;;  %p531_p2 = por %p530_p0, %p529_p10 }
  0x49   : > { %325 = vst [vmem:[%s231_s26 + $0x8] sm:$0x3] %v317_v38  ;;  %326 = vst [vmem:[%s231_s26 + $0xa] sm:$0x3] %v318_v39 }
  0x4a   : > { %327 = vst [vmem:[%s231_s26 + $0xc] sm:$0x3] %v319_v41  ;;  %328 = vst [vmem:[%s231_s26 + $0xe] sm:$0x3] %v320_v43  ;;  %p532_p4 = pnand %p531_p2, %p525_p8 }
  0x4c   : > { %535 = shalt.err (!%p532_p4)
}
  0x4d   : > { %s536_s9 = scalar_lea.hbm %s760_s0, 256  ;;  %s540_s8 = scalar_lea.hbm %s808_s4, 512 }
  0x4e   : > { %p537_p5 = scmp.ne.s32.totalorder %s760_s0, %s536_s9  ;;  %p541_p1 = scmp.lt.u32.totalorder %s760_s0, %s808_s4 }
  0x4f   : > { %p542_p3 = scmp.lt.u32.totalorder %s540_s8, %s536_s9  ;;  %p544_p6 = scmp.lt.u32.totalorder %s536_s9, %s760_s0 }
  0x50   : > { %p538_p7 = pnand %p537_p5, %p815_p12 }
  0x51   : > { %p543_p11 = por %p542_p3, %p541_p1 }
  0x52   : > { %p539_p9 = pneg %p538_p7 }
  0x53   : > { %p545_p13 = por %p544_p6, %p543_p11 }
  0x55   : > { %p546_p8 = pnand %p545_p13, %p539_p9 }
  0x57   : > { %549 = shalt.err (!%p546_p8)
}
  0x58   : > { %s594_s12 = smov 32   ;;  %s595_s15 = smov 2  }
  0x59   : > { %444 = dma.vmem_to_hbm [thread:$0]  (%p815_p12), %s755_s16, 256, %s760_s0, %s330_s25, %s594_s12, %s594_s12, %s595_s15  }
  0x5a PF: > { %s358_s26 = sand.u32 1, %s576_s17   ;;  %p816_p10 = scmp.ne.s32.totalorder %s813_s28, 0 }
  0x5b   : > { %p817_p0 = scmp.ge.s32.totalorder %s588_s19, 2  ;;  %s359_s20 = scalar_lea.sflag [#allocation6], %s358_s26 }
  0x5d   : > { %p451_p2 = pnand %p817_p0, %p816_p10 }
  0x5f   : > { %571 = dma.done.wait (!%p451_p2), %s359_s20, 256  }
  0x60   : > { %573 = vsyncadd (!%p451_p2), %s359_s20, 4294967040  ;;  %p19_p4 = scmp.ge.s32.totalorder %s649_s21, 4   ;;  %s818_s17 = smov %s580_s1 }
  0x61   : > { %s819_s1 = smov %s584_s18  ;;  %s820_s18 = smov %s661_s24 }
  0x62   : > { %s821_s19 = smov %s649_s21  ;;  %21 = sbr.rel (!%p19_p4) target bundleno = 7 (0x7), region = 84 }
  0x69   :  { %364 = vsyncpa [#allocation5], 1 }
  0x6a   :  { %366 = vsyncpa [#allocation5 + $0x1], 1 }
  0x6b   :  { %367 = vsyncpa [#allocation6], 1 }
  0x6c   :  { %369 = vsyncpa [#allocation6 + $0x1], 1 }

</bundles_post_ra>
